<compile_context>
chip_gen: v7x
topology: tpu7x:2x2x1
jax: 0.10.0
libtpu: 0.0.40
codegen_flags: <defaults>
</compile_context>

<pallas_src>
import functools
import math

import jax
import jax.numpy as jnp
from jax.experimental import pallas as pl
from jax.experimental.pallas import tpu as pltpu

V = 40          # vocab size
d = 20          # embedding dim
num_hops = 3    # memory hops

VP = 128        # padded vocab (lane) size
DP = 128        # padded embedding (lane) size
SUB = 8         # sublane alignment


def emn_kernel(x_ref, e_ref, w_ref, b_ref, out_ref, *, Bp, S):
    """EMN forward (fully padded, tile-aligned).

    x_ref : (S*Bp + Bp, VP)  stacked bag-of-words counts
            rows [s*Bp : (s+1)*Bp] = counts of story sentence s (batch rows padded to Bp)
            rows [S*Bp : S*Bp+Bp]  = counts of the query
    e_ref : (VP, 3*DP) = [eA_pad | eC_pad | eB_pad] concatenated, zero-padded tables
    w_ref : (DP, VP)   LinW weight, already transposed (u @ w gives logits)
    b_ref : (1, VP)    LinW bias, zero-padded
    out_ref: (Bp, VP)  padded logits (caller slices [:B, :V])
    """
    # --- fused embedding stage: ONE MXU matmul produces a, c and u0 --------------
    y = jnp.dot(x_ref[...], e_ref[...],
                preferred_element_type=jnp.float32)          # (S*Bp + Bp, 3*DP)

    # 8-sublane / 128-lane aligned static slices: pure views, no relayout.
    a3 = y[0:S * Bp, 0:DP].reshape(S, Bp, DP)                # (S, Bp, DP)
    c3 = y[0:S * Bp, DP:2 * DP].reshape(S, Bp, DP)           # (S, Bp, DP)
    u = y[S * Bp:S * Bp + Bp, 2 * DP:3 * DP]                 # (Bp, DP) query embedding sum

    # --- memory hops: slab ops over all S sentences at once (VPU/XLU/EUP) --------
    for _ in range(num_hops):
        # scores: one multiply + one lane reduce over the whole (S, Bp, DP) slab
        ip = jnp.sum(a3 * u[None, :, :], axis=2, keepdims=True)     # (S, Bp, 1)
        # max-stabilized, un-normalized softmax over the S sentence blocks
        m = jnp.max(ip, axis=0, keepdims=True)                      # (1, Bp, 1)
        ex = jnp.exp(ip - m)                                        # (S, Bp, 1)
        denom = jnp.sum(ex, axis=0)                                 # (Bp, 1)
        # weighted memory read: one multiply + one reduce over S
        o = jnp.sum(ex * c3, axis=0)                                # (Bp, DP)
        # fold 1/sum into the small (Bp, DP) result; exact reciprocal keeps 1e-5 tol
        u = o * pl.reciprocal(denom) + u

    # --- final Linear: one MXU matmul + one unmasked full-tile store --------------
    logits = jnp.dot(u, w_ref[...], preferred_element_type=jnp.float32) + b_ref[...]
    out_ref[...] = logits                                           # (Bp, VP)


def _bow_counts_padded(ids, vocab_padded):
    """Bag-of-words counts via dense one-hot + sum (no scatter), padded vocab width."""
    onehot = jax.nn.one_hot(ids, vocab_padded, dtype=jnp.float32)   # (..., L, Vp)
    return jnp.sum(onehot, axis=-2)                                 # (..., Vp)


def _pad2(a, rows, cols):
    a = a.astype(jnp.float32)
    return jnp.pad(a, ((0, rows - a.shape[0]), (0, cols - a.shape[1])))


def emn_forward(story, query, eA, eB, eC, W, bias):
    """story: (B, S, L) int32, query: (B, Lq) int32 -> (B, V) float32."""
    B, S, _ = story.shape
    Bp = ((B + SUB - 1) // SUB) * SUB

    # Bag-of-words counts with vocab padding fused in (dense one-hot, no scatter).
    story_counts = _bow_counts_padded(story, VP)                    # (B, S, VP)
    query_counts = _bow_counts_padded(query, VP)                    # (B, VP)

    # Pad batch rows to the sublane multiple, lay out sentence-major.
    story_counts = jnp.pad(story_counts, ((0, Bp - B), (0, 0), (0, 0)))   # (Bp, S, VP)
    query_counts = jnp.pad(query_counts, ((0, Bp - B), (0, 0)))           # (Bp, VP)
    x = jnp.concatenate(
        [jnp.transpose(story_counts, (1, 0, 2)).reshape(S * Bp, VP), query_counts],
        axis=0)                                                     # (S*Bp + Bp, VP)

    # Zero-padded, lane-tile-aligned embedding tables: [eA | eC | eB].
    e_cat = jnp.concatenate(
        [_pad2(eA, VP, DP), _pad2(eC, VP, DP), _pad2(eB, VP, DP)], axis=1)  # (VP, 3*DP)

    # Pre-transpose LinW: logits = u @ W.T, so pass W.T padded to (DP, VP).
    w_t = _pad2(W.T, DP, VP)                                        # (DP, VP)
    bias_p = jnp.pad(bias.astype(jnp.float32), (0, VP - V)).reshape(1, VP)

    kernel = functools.partial(emn_kernel, Bp=Bp, S=S)
    # TODO(synk): if B/S/V scale up, add a grid over the batch dim
    # (dimension_semantics=("parallel",) for v7x's 2 TCs) with per-block BlockSpecs and
    # an explicit vmem_limit_bytes; at Bp=8 a grid would only add per-step overhead.
    out = pl.pallas_call(
        kernel,
        out_shape=jax.ShapeDtypeStruct((Bp, VP), jnp.float32),
        in_specs=[pl.BlockSpec(memory_space=pltpu.MemorySpace.VMEM)] * 4,
        out_specs=pl.BlockSpec(memory_space=pltpu.MemorySpace.VMEM),
    )(x, e_cat, w_t, bias_p)

    return out[:B, :V]


def emn_reference(story, query, eA, eB, eC, W, bias):
    """Pure-JAX transcription of the PyTorch forward for validation."""
    u = jnp.sum(eB[query], axis=1)                                  # (B, d)
    for _ in range(num_hops):
        a_embed = jnp.sum(eA[story], axis=2)                        # (B, S, d)
        c = jnp.sum(eC[story], axis=2)                              # (B, S, d)
        ip = jnp.einsum('bsd,bd->bs', a_embed, u)                   # (B, S)
        p = jax.nn.softmax(ip, axis=-1)
        o = jnp.einsum('bs,bsd->bd', p, c)                          # (B, d)
        u = o + u
    return u @ W.T + bias                                           # (B, V)


if __name__ == "__main__":
    # Deterministic synthetic parameters (matching nn.Module shapes & init stats).
    key = jax.random.PRNGKey(0)
    kA, kB, kC, kW, kb, ks, kq = jax.random.split(key, 7)
    eA = 0.1 * jax.random.normal(kA, (V, d), dtype=jnp.float32)         # embedA ~ N(0, 0.1)
    eB = 0.1 * jax.random.normal(kB, (V, d), dtype=jnp.float32)         # embedB ~ N(0, 0.1)
    eC = 0.1 * jax.random.normal(kC, (V, d), dtype=jnp.float32)         # embedC ~ N(0, 0.1)
    W = -0.25 + 0.25 * jax.random.normal(kW, (V, d), dtype=jnp.float32)  # LinW.weight ~ N(-0.25, 0.25)
    bound = 1.0 / math.sqrt(d)
    bias = jax.random.uniform(kb, (V,), minval=-bound, maxval=bound,
                              dtype=jnp.float32)                        # LinW.bias default init

    # Small example inputs: batch=2, 5 story sentences of 6 tokens, query of 10 tokens.
    B, S, L, Lq = 2, 5, 6, 10
    story = jax.random.randint(ks, (B, S, L), 0, V, dtype=jnp.int32)
    query = jax.random.randint(kq, (B, Lq), 0, V, dtype=jnp.int32)

    out = emn_forward(story, query, eA, eB, eC, W, bias)
    out = jax.block_until_ready(out)

    ref = emn_reference(story, query, eA, eB, eC, W, bias)
    assert out.shape == (B, V)
    assert jnp.allclose(out, ref, rtol=1e-5, atol=1e-5), (out, ref)

    print("KERNEL_OK")
</pallas_src>

<mosaic_0001>
module attributes {stable_mosaic.version = 11 : i64} {
  func.func @emn_kernel(%arg0: memref<48x128xf32, #tpu.memory_space<vmem>>, %arg1: memref<128x384xf32, #tpu.memory_space<vmem>>, %arg2: memref<128x128xf32, #tpu.memory_space<vmem>>, %arg3: memref<1x128xf32, #tpu.memory_space<vmem>>, %arg4: memref<8x128xf32, #tpu.memory_space<vmem>>) attributes {dimension_semantics = [], scalar_prefetch = 0 : i64, scratch_operands = 0 : i64, tpu.core_type = #tpu.core_type<tc>} {
    %c0 = arith.constant 0 : index
    %c0_0 = arith.constant 0 : index
    %0 = vector.load %arg0[%c0, %c0_0] : memref<48x128xf32, #tpu.memory_space<vmem>>, vector<48x128xf32>
    %c0_1 = arith.constant 0 : index
    %c0_2 = arith.constant 0 : index
    %1 = vector.load %arg1[%c0_1, %c0_2] : memref<128x384xf32, #tpu.memory_space<vmem>>, vector<128x384xf32>
    %cst = arith.constant dense<0.000000e+00> : vector<48x384xf32>
    %2 = tpu.matmul %0, %1, %cst {dimension_numbers = #tpu.dot_dimension_numbers<[1], [0], [0], [1], [0, 0, 1, 1], [], []>} : vector<48x128xf32>, vector<128x384xf32>, vector<48x384xf32> -> vector<48x384xf32>
    %3 = vector.extract_strided_slice %2 {offsets = [0, 0], sizes = [40, 128], strides = [1, 1]} : vector<48x384xf32> to vector<40x128xf32>
    %4 = vector.shape_cast %3 : vector<40x128xf32> to vector<5x8x128xf32>
    %5 = vector.extract_strided_slice %2 {offsets = [0, 128], sizes = [40, 128], strides = [1, 1]} : vector<48x384xf32> to vector<40x128xf32>
    %6 = vector.shape_cast %5 : vector<40x128xf32> to vector<5x8x128xf32>
    %7 = vector.extract_strided_slice %2 {offsets = [40, 256], sizes = [8, 128], strides = [1, 1]} : vector<48x384xf32> to vector<8x128xf32>
    %8 = vector.shape_cast %7 : vector<8x128xf32> to vector<1x8x128xf32>
    %9 = vector.broadcast %8 : vector<1x8x128xf32> to vector<5x8x128xf32>
    %10 = arith.mulf %4, %9 : vector<5x8x128xf32>
    %cst_3 = arith.constant dense<0.000000e+00> : vector<5x8xf32>
    %11 = vector.multi_reduction <add>, %10, %cst_3 [2] : vector<5x8x128xf32> to vector<5x8xf32>
    %12 = vector.shape_cast %11 : vector<5x8xf32> to vector<5x8x1xf32>
    %cst_4 = arith.constant dense<0xFF800000> : vector<8x1xf32>
    %13 = vector.multi_reduction <maximumf>, %12, %cst_4 [0] : vector<5x8x1xf32> to vector<8x1xf32>
    %14 = vector.shape_cast %13 : vector<8x1xf32> to vector<1x8x1xf32>
    %15 = vector.broadcast %14 : vector<1x8x1xf32> to vector<5x8x1xf32>
    %16 = arith.subf %12, %15 : vector<5x8x1xf32>
    %17 = math.exp %16 : vector<5x8x1xf32>
    %cst_5 = arith.constant dense<0.000000e+00> : vector<8x1xf32>
    %18 = vector.multi_reduction <add>, %17, %cst_5 [0] : vector<5x8x1xf32> to vector<8x1xf32>
    %19 = vector.broadcast %17 : vector<5x8x1xf32> to vector<5x8x128xf32>
    %20 = arith.mulf %19, %6 : vector<5x8x128xf32>
    %cst_6 = arith.constant dense<0.000000e+00> : vector<8x128xf32>
    %21 = vector.multi_reduction <add>, %20, %cst_6 [0] : vector<5x8x128xf32> to vector<8x128xf32>
    %22 = tpu.reciprocal %18 : vector<8x1xf32> -> vector<8x1xf32>
    %23 = vector.broadcast %22 : vector<8x1xf32> to vector<8x128xf32>
    %24 = arith.mulf %21, %23 : vector<8x128xf32>
    %25 = arith.addf %24, %7 : vector<8x128xf32>
    %26 = vector.shape_cast %25 : vector<8x128xf32> to vector<1x8x128xf32>
    %27 = vector.broadcast %26 : vector<1x8x128xf32> to vector<5x8x128xf32>
    %28 = arith.mulf %4, %27 : vector<5x8x128xf32>
    %cst_7 = arith.constant dense<0.000000e+00> : vector<5x8xf32>
    %29 = vector.multi_reduction <add>, %28, %cst_7 [2] : vector<5x8x128xf32> to vector<5x8xf32>
    %30 = vector.shape_cast %29 : vector<5x8xf32> to vector<5x8x1xf32>
    %cst_8 = arith.constant dense<0xFF800000> : vector<8x1xf32>
    %31 = vector.multi_reduction <maximumf>, %30, %cst_8 [0] : vector<5x8x1xf32> to vector<8x1xf32>
    %32 = vector.shape_cast %31 : vector<8x1xf32> to vector<1x8x1xf32>
    %33 = vector.broadcast %32 : vector<1x8x1xf32> to vector<5x8x1xf32>
    %34 = arith.subf %30, %33 : vector<5x8x1xf32>
    %35 = math.exp %34 : vector<5x8x1xf32>
    %cst_9 = arith.constant dense<0.000000e+00> : vector<8x1xf32>
    %36 = vector.multi_reduction <add>, %35, %cst_9 [0] : vector<5x8x1xf32> to vector<8x1xf32>
    %37 = vector.broadcast %35 : vector<5x8x1xf32> to vector<5x8x128xf32>
    %38 = arith.mulf %37, %6 : vector<5x8x128xf32>
    %cst_10 = arith.constant dense<0.000000e+00> : vector<8x128xf32>
    %39 = vector.multi_reduction <add>, %38, %cst_10 [0] : vector<5x8x128xf32> to vector<8x128xf32>
    %40 = tpu.reciprocal %36 : vector<8x1xf32> -> vector<8x1xf32>
    %41 = vector.broadcast %40 : vector<8x1xf32> to vector<8x128xf32>
    %42 = arith.mulf %39, %41 : vector<8x128xf32>
    %43 = arith.addf %42, %25 : vector<8x128xf32>
    %44 = vector.shape_cast %43 : vector<8x128xf32> to vector<1x8x128xf32>
    %45 = vector.broadcast %44 : vector<1x8x128xf32> to vector<5x8x128xf32>
    %46 = arith.mulf %4, %45 : vector<5x8x128xf32>
    %cst_11 = arith.constant dense<0.000000e+00> : vector<5x8xf32>
    %47 = vector.multi_reduction <add>, %46, %cst_11 [2] : vector<5x8x128xf32> to vector<5x8xf32>
    %48 = vector.shape_cast %47 : vector<5x8xf32> to vector<5x8x1xf32>
    %cst_12 = arith.constant dense<0xFF800000> : vector<8x1xf32>
    %49 = vector.multi_reduction <maximumf>, %48, %cst_12 [0] : vector<5x8x1xf32> to vector<8x1xf32>
    %50 = vector.shape_cast %49 : vector<8x1xf32> to vector<1x8x1xf32>
    %51 = vector.broadcast %50 : vector<1x8x1xf32> to vector<5x8x1xf32>
    %52 = arith.subf %48, %51 : vector<5x8x1xf32>
    %53 = math.exp %52 : vector<5x8x1xf32>
    %cst_13 = arith.constant dense<0.000000e+00> : vector<8x1xf32>
    %54 = vector.multi_reduction <add>, %53, %cst_13 [0] : vector<5x8x1xf32> to vector<8x1xf32>
    %55 = vector.broadcast %53 : vector<5x8x1xf32> to vector<5x8x128xf32>
    %56 = arith.mulf %55, %6 : vector<5x8x128xf32>
    %cst_14 = arith.constant dense<0.000000e+00> : vector<8x128xf32>
    %57 = vector.multi_reduction <add>, %56, %cst_14 [0] : vector<5x8x128xf32> to vector<8x128xf32>
    %58 = tpu.reciprocal %54 : vector<8x1xf32> -> vector<8x1xf32>
    %59 = vector.broadcast %58 : vector<8x1xf32> to vector<8x128xf32>
    %60 = arith.mulf %57, %59 : vector<8x128xf32>
    %61 = arith.addf %60, %43 : vector<8x128xf32>
    %c0_15 = arith.constant 0 : index
    %c0_16 = arith.constant 0 : index
    %62 = vector.load %arg2[%c0_15, %c0_16] : memref<128x128xf32, #tpu.memory_space<vmem>>, vector<128x128xf32>
    %cst_17 = arith.constant dense<0.000000e+00> : vector<8x128xf32>
    %63 = tpu.matmul %61, %62, %cst_17 {dimension_numbers = #tpu.dot_dimension_numbers<[1], [0], [0], [1], [0, 0, 1, 1], [], []>} : vector<8x128xf32>, vector<128x128xf32>, vector<8x128xf32> -> vector<8x128xf32>
    %c0_18 = arith.constant 0 : index
    %c0_19 = arith.constant 0 : index
    %64 = vector.load %arg3[%c0_18, %c0_19] : memref<1x128xf32, #tpu.memory_space<vmem>>, vector<1x128xf32>
    %65 = vector.broadcast %64 : vector<1x128xf32> to vector<8x128xf32>
    %66 = arith.addf %63, %65 : vector<8x128xf32>
    %c0_20 = arith.constant 0 : index
    %c0_21 = arith.constant 0 : index
    %67 = vector.load %arg4[%c0_20, %c0_21] : memref<8x128xf32, #tpu.memory_space<vmem>>, vector<8x128xf32>
    tpu.vector_store %arg4[%c0_20, %c0_21], %66 {strides = array<i32>} : memref<8x128xf32, #tpu.memory_space<vmem>>, vector<8x128xf32>,
    return
  }
}

</mosaic_0001>

<bundles_post_ra>
// kernel: tpu_custom_call.1
= control target key start
LH: loop header
LB: loop body
LE: loop exit
PB: predicated region body
PF: predicated region fallthrough
CT: control target
= control target key end

     0   :  { %9 = vsyncpa [#allocation3], 0  ;;  %s1067_s0 = inlined_call_operand.hbm [shape: f32[48,128], index: 0, kind: input, shape index: {}]   ;;  %s1068_s1 = inlined_call_operand.hbm [shape: f32[128,384], index: 1, kind: input, shape index: {}]   ;;  %s1069_s2 = inlined_call_operand.hbm [shape: f32[128,128], index: 2, kind: input, shape index: {}]   ;;  %s1070_s3 = inlined_call_operand.vmem [shape: f32[1,128], index: 3, kind: input, shape index: {}]   ;;  %s1071_s4 = inlined_call_operand.hbm [shape: f32[8,128], index: 4, kind: output, shape index: {}]  }
   0x1   :  { %10 = vsyncpa [#allocation6], 0 }
   0x2   :  { %11 = vsyncpa [#allocation4], 0  ;;  %s907_s15 = smov [#allocation5]   ;;  %s813_s19 = scalar_lea.hbm %s1068_s1, 6144 }
   0x3   :  { %s29_s16 = sshll.u32 %s907_s15, 4  ;;  %p814_p0 = scmp.ne.s32.totalorder %s1068_s1, %s813_s19  ;;  %s30_s16 = int_to_ptr.vmem [resolvable:$true] %s29_s16 }
   0x4   :  { %p817_p1 = scmp.lt.u32.totalorder %s813_s19, %s1068_s1 }
   0x6   :  { %p819_p2 = pnand %p817_p1, %p814_p0 }
   0x8   :  { %822 = shalt.err (!%p819_p2)
}
   0x9   :  { %s823_s24 = scalar_lea.vmem %s30_s16, 6144  ;;  %p828_p4 = scmp.lt.s32.totalorder %s30_s16, %s30_s16 }
   0xa   :  { %p824_p3 = scmp.ne.s32.totalorder %s30_s16, %s823_s24  ;;  %p829_p5 = scmp.lt.s32.totalorder %s823_s24, %s823_s24 }
   0xc   :  { %p830_p6 = por %p829_p5, %p828_p4 }
   0xe   :  { %p831_p7 = pnand %p830_p6, %p824_p3 }
  0x10   :  { %834 = shalt.err (!%p831_p7)
}
  0x11   :  { %s908_s25 = smov 384   ;;  %s909_s26 = smov 24  }
  0x12   :  { %35 = dma.hbm_to_vmem [thread:$0]  %s1068_s1, 6144, %s30_s16, [#allocation6], %s908_s25, %s908_s25, %s909_s26  }
  0x13   :  { %s910_s29 = smov [#allocation2]   ;;  %s835_s7 = scalar_lea.hbm %s1067_s0, 768 }
  0x14   :  { %s17_s30 = sshll.u32 %s910_s29, 4  ;;  %p836_p8 = scmp.ne.s32.totalorder %s1067_s0, %s835_s7  ;;  %s18_s30 = int_to_ptr.vmem [resolvable:$true] %s17_s30 }
  0x15   :  { %p839_p9 = scmp.lt.u32.totalorder %s835_s7, %s1067_s0 }
  0x17   :  { %p841_p10 = pnand %p839_p9, %p836_p8 }
  0x19   :  { %844 = shalt.err (!%p841_p10)
}
  0x1a   :  { %s845_s12 = scalar_lea.vmem %s18_s30, 768  ;;  %p850_p12 = scmp.lt.s32.totalorder %s18_s30, %s18_s30 }
  0x1b   :  { %p846_p11 = scmp.ne.s32.totalorder %s18_s30, %s845_s12  ;;  %p851_p13 = scmp.lt.s32.totalorder %s845_s12, %s845_s12 }
  0x1d   :  { %p852_p0 = por %p851_p13, %p850_p12 }
  0x1f   :  { %p853_p1 = pnand %p852_p0, %p846_p11 }
  0x21   :  { %856 = shalt.err (!%p853_p1)
}
  0x22   :  { %s911_s1 = smov 128   ;;  %s912_s13 = smov 8  }
  0x23   :  { %23 = dma.hbm_to_vmem [thread:$0]  %s1067_s0, 768, %s18_s30, [#allocation3], %s911_s1, %s911_s1, %s912_s13  }
  0x24   :  { %s913_s16 = smov [#allocation7]   ;;  %s857_s20 = scalar_lea.hbm %s1069_s2, 2048 }
  0x25   :  { %s41_s17 = sshll.u32 %s913_s16, 4  ;;  %p858_p2 = scmp.ne.s32.totalorder %s1069_s2, %s857_s20  ;;  %s42_s17 = int_to_ptr.vmem [resolvable:$true] %s41_s17 }
  0x26   :  { %p861_p3 = scmp.lt.u32.totalorder %s857_s20, %s1069_s2 }
  0x28   :  { %p863_p4 = pnand %p861_p3, %p858_p2 }
  0x2a   :  { %866 = shalt.err (!%p863_p4)
}
  0x2b   :  { %s867_s25 = scalar_lea.vmem %s42_s17, 2048  ;;  %p872_p6 = scmp.lt.s32.totalorder %s42_s17, %s42_s17 }
  0x2c   :  { %p868_p5 = scmp.ne.s32.totalorder %s42_s17, %s867_s25  ;;  %p873_p7 = scmp.lt.s32.totalorder %s867_s25, %s867_s25 }
  0x2e   :  { %p874_p8 = por %p873_p7, %p872_p6 }
  0x30   :  { %p875_p9 = pnand %p874_p8, %p868_p5 }
  0x32   :  { %878 = shalt.err (!%p875_p9)
}
  0x33   :  { %47 = dma.hbm_to_vmem [thread:$0]  %s1069_s2, 2048, %s42_s17, [#allocation6], %s911_s1, %s911_s1, %s912_s13  }
  0x34   :  { %901 = dma.done.wait [#allocation3], 768  }
  0x35   :  { %902 = vsyncadd [#allocation3], 4294966528 }
  0x36   :  { %903 = dma.done.wait [#allocation6], 8192  }
  0x37   :  { %904 = vsyncadd [#allocation6], 4294959104  ;;  %v914_v0 = vmov 0.0   ;;  %v66_v1 = vld [vmem:[#allocation5 + $0x8] sm:$0xff]  ;;  %v69_v2 = vld [vmem:[#allocation5 + $0x20] sm:$0xff]  ;;  %vm916_vm0 = vmmov 0  }
  0x38   :  { %177 = vmatprep.mubr.f32.mxu0 %v914_v0  ;;  %v67_v3 = vld [vmem:[#allocation5 + $0x10] sm:$0xff]  ;;  %v678_v4 = vpack.c.bf16 %v69_v2, %v66_v1  ;;  %v70_v5 = vld [vmem:[#allocation5 + $0x28] sm:$0xff]  ;;  %v65_v6 = vld [vmem:[#allocation5] sm:$0xff]  ;;  %s917_s28 = smov [#allocation8]  }
  0x39   :  { %v68_v7 = vld [vmem:[#allocation5 + $0x18] sm:$0xff]  ;;  %v710_v8 = vpack.c.bf16 %v70_v5, %v67_v3  ;;  %v75_v11 = vld [vmem:[#allocation5 + $0x50] sm:$0xff]  ;;  %v73_v12 = vld [vmem:[#allocation5 + $0x40] sm:$0xff]  ;;  %s552_s29 = sshll.u32 %s917_s28, 4  ;;  %s553_s29 = int_to_ptr.vmem [resolvable:$true] %s552_s29 }
  0x3a   :  { %v680_v9 = vpack.c.bf16 %v68_v7, %v65_v6  ;;  %v72_v10 = vld [vmem:[#allocation5 + $0x38] sm:$0xff]  ;;  %679 = vmatprep.subr.bf16.mxu0 %v678_v4  ;;  %v71_v15 = vld [vmem:[#allocation5 + $0x30] sm:$0xff]  ;;  %v74_v16 = vld [vmem:[#allocation5 + $0x48] sm:$0xff]  ;;  %s879_s30 = scalar_lea.vmem %s553_s29, 128  ;;  %p884_p11 = scmp.lt.s32.totalorder %s553_s29, %s553_s29 }
  0x3b   :  { %v682_v13 = vpack.c.bf16 %v75_v11, %v72_v10  ;;  %v76_v14 = vld [vmem:[#allocation5 + $0x58] sm:$0xff]  ;;  %711 = vmatprep.subr.bf16.mxu1 %v710_v8  ;;  %v684_v18 = vpack.c.bf16 %v74_v16, %v71_v15  ;;  %v78_v19 = vld [vmem:[#allocation5 + $0x68] sm:$0xff]  ;;  %v81_v20 = vld [vmem:[#allocation5 + $0x80] sm:$0xff]  ;;  %p880_p10 = scmp.ne.s32.totalorder %s553_s29, %s879_s30  ;;  %p885_p12 = scmp.lt.s32.totalorder %s879_s30, %s879_s30 }
  0x3c   :  { %681 = vmatpush1.bf16.msra.mxu0 %v680_v9  ;;  %v714_v17 = vpack.c.bf16 %v76_v14, %v73_v12  ;;  %v79_v21 = vld [vmem:[#allocation5 + $0x70] sm:$0xff]  ;;  %713 = vmatpush3.bf16.msra.mxu1 %v710_v8  ;;  %v686_v22 = vpack.c.bf16 %v81_v20, %v78_v19  ;;  %v82_v23 = vld [vmem:[#allocation5 + $0x88] sm:$0xff]  ;;  %v77_v24 = vld [vmem:[#allocation5 + $0x60] sm:$0xff] }
  0x3d   :  { %683 = vmatprep.subr.bf16.mxu0 %v682_v13  ;;  %v80_v25 = vld [vmem:[#allocation5 + $0x78] sm:$0xff]  ;;  %v718_v26 = vpack.c.bf16 %v82_v23, %v79_v21  ;;  %v87_v28 = vld [vmem:[#allocation5 + $0xb0] sm:$0xff]  ;;  %v85_v29 = vld [vmem:[#allocation5 + $0xa0] sm:$0xff]  ;;  %p886_p13 = por %p885_p12, %p884_p11 }
  0x3e   :  { %715 = vmatprep.subr.bf16.mxu1 %v714_v17  ;;  %v84_v27 = vld [vmem:[#allocation5 + $0x98] sm:$0xff]  ;;  %v688_v31 = vpack.c.bf16 %v80_v25, %v77_v24  ;;  %v83_v33 = vld [vmem:[#allocation5 + $0x90] sm:$0xff]  ;;  %v86_v34 = vld [vmem:[#allocation5 + $0xa8] sm:$0xff] }
  0x3f   :  { %v88_v30 = vld [vmem:[#allocation5 + $0xb8] sm:$0xff]  ;;  %v690_v32 = vpack.c.bf16 %v87_v28, %v84_v27  ;;  %v90_v36 = vld [vmem:[#allocation5 + $0xc8] sm:$0xff]  ;;  %v93_v37 = vld [vmem:[#allocation5 + $0xe0] sm:$0xff]  ;;  %v692_v40 = vpack.c.bf16 %v86_v34, %v83_v33  ;;  %p887_p0 = pnand %p886_p13, %p880_p10 }
  0x40   :  { %685 = vmatpush1.bf16.msra.mxu0 %v684_v18  ;;  %717 = vmatpush3.bf16.msra.mxu1 %v714_v17  ;;  %v722_v35 = vpack.c.bf16 %v88_v30, %v85_v29  ;;  %v91_v38 = vld [vmem:[#allocation5 + $0xd0] sm:$0xff]  ;;  %v94_v39 = vld [vmem:[#allocation5 + $0xe8] sm:$0xff]  ;;  %v694_v41 = vpack.c.bf16 %v93_v37, %v90_v36  ;;  %v89_v42 = vld [vmem:[#allocation5 + $0xc0] sm:$0xff] }
  0x41   :  { %687 = vmatprep.subr.bf16.mxu0 %v686_v22  ;;  %719 = vmatprep.subr.bf16.mxu1 %v718_v26  ;;  %v92_v43 = vld [vmem:[#allocation5 + $0xd8] sm:$0xff]  ;;  %v726_v44 = vpack.c.bf16 %v94_v39, %v91_v38  ;;  %v99_v46 = vld [vmem:[#allocation5 + $0x110] sm:$0xff]  ;;  %v97_v47 = vld [vmem:[#allocation5 + $0x100] sm:$0xff] }
  0x42   :  { %v96_v45 = vld [vmem:[#allocation5 + $0xf8] sm:$0xff]  ;;  %v696_v49 = vpack.c.bf16 %v92_v43, %v89_v42  ;;  %v59_v50 = vld [vmem:[#allocation2] sm:$0xff]  ;;  %v98_v53 = vld [vmem:[#allocation5 + $0x108] sm:$0xff] }
  0x43   :  { %v100_v48 = vld [vmem:[#allocation5 + $0x118] sm:$0xff]  ;;  %v698_v51 = vpack.c.bf16 %v99_v46, %v96_v45  ;;  %v95_v52 = vld [vmem:[#allocation5 + $0xf0] sm:$0xff]  ;;  %v102_v55 = vld [vmem:[#allocation5 + $0x128] sm:$0xff]  ;;  %634 = vmatprep.mubr.f32.mxu1 %v59_v50 }
  0x44   :  { %689 = vmatpush1.bf16.msra.mxu0 %v688_v31  ;;  %721 = vmatpush3.bf16.msra.mxu1 %v718_v26  ;;  %v730_v54 = vpack.c.bf16 %v100_v48, %v97_v47  ;;  %v105_v56 = vld [vmem:[#allocation5 + $0x140] sm:$0xff]  ;;  %v103_v57 = vld [vmem:[#allocation5 + $0x130] sm:$0xff]  ;;  %v106_v58 = vld [vmem:[#allocation5 + $0x148] sm:$0xff]  ;;  %v700_v59 = vpack.c.bf16 %v98_v53, %v95_v52 }
  0x45   :  { %691 = vmatprep.subr.bf16.mxu0 %v690_v32  ;;  %723 = vmatprep.subr.bf16.mxu1 %v722_v35  ;;  %v702_v60 = vpack.c.bf16 %v105_v56, %v102_v55  ;;  %v101_v61 = vld [vmem:[#allocation5 + $0x120] sm:$0xff]  ;;  %v104_v62 = vld [vmem:[#allocation5 + $0x138] sm:$0xff]  ;;  %v734_v63 = vpack.c.bf16 %v106_v58, %v103_v57  ;;  %v111_v2 = vld [vmem:[#allocation5 + $0x170] sm:$0xff] }
  0x46   :  { %v108_v1 = vld [vmem:[#allocation5 + $0x158] sm:$0xff]  ;;  %v109_v3 = vld [vmem:[#allocation5 + $0x160] sm:$0xff]  ;;  %v704_v5 = vpack.c.bf16 %v104_v62, %v101_v61  ;;  %v107_v7 = vld [vmem:[#allocation5 + $0x150] sm:$0xff] }
  0x47   :  { %v112_v4 = vld [vmem:[#allocation5 + $0x178] sm:$0xff]  ;;  %v706_v6 = vpack.c.bf16 %v111_v2, %v108_v1  ;;  %v110_v8 = vld [vmem:[#allocation5 + $0x168] sm:$0xff]  ;;  %v61_v12 = vld [vmem:[#allocation2 + $0x10] sm:$0xff] }
  0x48   :  { %693 = vmatpush1.bf16.msra.mxu0 %v692_v40  ;;  %725 = vmatpush3.bf16.msra.mxu1 %v722_v35  ;;  %v738_v9 = vpack.c.bf16 %v112_v4, %v109_v3  ;;  %v708_v10 = vpack.c.bf16 %v110_v8, %v107_v7  ;;  %v60_v11 = vld [vmem:[#allocation2 + $0x8] sm:$0xff]  ;;  %v62_v13 = vld [vmem:[#allocation2 + $0x18] sm:$0xff]  ;;  %v63_v14 = vld [vmem:[#allocation2 + $0x20] sm:$0xff] }
  0x49   :  { %695 = vmatprep.subr.bf16.mxu0 %v694_v41  ;;  %727 = vmatprep.subr.bf16.mxu1 %v726_v44  ;;  %v64_v15 = vld [vmem:[#allocation2 + $0x28] sm:$0xff] }
  0x4c   :  { %697 = vmatpush1.bf16.msra.mxu0 %v696_v49  ;;  %729 = vmatpush3.bf16.msra.mxu1 %v726_v44 }
  0x4d   :  { %699 = vmatprep.subr.bf16.mxu0 %v698_v51  ;;  %731 = vmatprep.subr.bf16.mxu1 %v730_v54 }
  0x50   :  { %701 = vmatpush1.bf16.msra.mxu0 %v700_v59  ;;  %733 = vmatpush3.bf16.msra.mxu1 %v730_v54 }
  0x51   :  { %703 = vmatprep.subr.bf16.mxu0 %v702_v60  ;;  %735 = vmatprep.subr.bf16.mxu1 %v734_v63 }
  0x54   :  { %705 = vmatpush1.bf16.msra.mxu0 %v704_v5  ;;  %737 = vmatpush3.bf16.msra.mxu1 %v734_v63 }
  0x55   :  { %707 = vmatprep.subr.bf16.mxu0 %v706_v6  ;;  %739 = vmatprep.subr.bf16.mxu1 %v738_v9 }
  0x58   :  { %709 = vmatpush1.bf16.msra.mxu0 %v708_v10  ;;  %741 = vmatpush3.bf16.msra.mxu1 %v738_v9 }
  0x5b   :  { %178 = vmatmul.mubr.f32.vlgmr.msra.gmra.mrb[0].mxu0 %v59_v50  ;;  %635 = vmatmul.mubr.f32.vlgmr.msra.gmra.mrb[0].mxu1 %v60_v11 }
  0x5c   :  { %183 = vmatprep.mubr.f32.mxu0 %v914_v0  ;;  %637 = vmatprep.mubr.f32.mxu1 %v61_v12 }
  0x5f   :  { %184 = vmatmul.mubr.f32.gmra.mrb[2].mxu0 %v60_v11  ;;  %638 = vmatmul.mubr.f32.gmra.mrb[2].mxu1 %v62_v13 }
  0x60   :  { %189 = vmatprep.mubr.f32.mxu0 %v914_v0  ;;  %640 = vmatprep.mubr.f32.mxu1 %v63_v14 }
  0x63   :  { %190 = vmatmul.mubr.f32.gmra.mrb[4].mxu0 %v61_v12  ;;  %641 = vmatmul.mubr.f32.gmra.mrb[4].mxu1 %v64_v15 }
  0x64   :  { %195 = vmatprep.mubr.f32.mxu0 %v914_v0 }
  0x67   :  { %196 = vmatmul.mubr.f32.gmra.mrb[6].mxu0 %v62_v13 }
  0x68   :  { %201 = vmatprep.mubr.f32.mxu0 %v914_v0 }
  0x6b   :  { %202 = vmatmul.mubr.f32.gmra.mrb[8].mxu0 %v63_v14 }
  0x6c   :  { %207 = vmatprep.mubr.f32.mxu0 %v914_v0 }
  0x6f   :  { %208 = vmatmul.mubr.f32.gmra.mrb[10].mxu0 %v64_v15 }
  0x70   :  { %675 = vmatprep.mubr.msk.f32.mxu0 %vm916_vm0, %v914_v0 }
 0x12e   :  { %v985_v16 = vpop.f32.mrb[0].mxu0  ;;  %v636_v18 = vpop.f32.mrb[0].mxu1 }
 0x12f   :  { %v987_v17 = vpop.f32.mrb[1].mxu0  ;;  %v278_v19 = vpop.f32.mrb[1].mxu1 }
 0x132   :  { %v989_v20 = vpop.f32.mrb[2].mxu0  ;;  %v639_v22 = vpop.f32.mrb[2].mxu1 }
 0x133   :  { %v991_v21 = vpop.f32.mrb[3].mxu0  ;;  %v286_v23 = vpop.f32.mrb[3].mxu1 }
 0x136   :  { %v993_v24 = vpop.f32.mrb[4].mxu0  ;;  %v995_v25 = vpop.f32.mrb[4].mxu1 }
 0x137   :  { %v997_v26 = vpop.f32.mrb[5].mxu0  ;;  %v302_v27 = vmul.f32 %v995_v25, %v985_v16  ;;  %v303_v28 = vmul.f32 %v995_v25, %v989_v20  ;;  %v294_v29 = vpop.f32.mrb[5].mxu1  ;;  %v304_v30 = vmul.f32 %v995_v25, %v993_v24 }
 0x139   :  { %307 = vadd.xlane.f32.xlu0 %v302_v27  ;;  %309 = vadd.xlane.f32.xlu1 %v303_v28 }
 0x13a   :  { %v1005_v31 = vpop.f32.mrb[6].mxu0 }
 0x13b   :  { %v1007_v32 = vpop.f32.mrb[7].mxu0  ;;  %v305_v33 = vmul.f32 %v995_v25, %v1005_v31 }
 0x13d   :  { %311 = vadd.xlane.f32.xlu1 %v304_v30 }
 0x13e   :  { %v1011_v34 = vpop.f32.mrb[8].mxu0 }
 0x13f   :  { %v1013_v35 = vpop.f32.mrb[9].mxu0  ;;  %v306_v36 = vmul.f32 %v995_v25, %v1011_v34 }
 0x141   :  { %315 = vadd.xlane.f32.xlu0 %v306_v36 }
 0x142   :  { %v209_v37 = vpop.f32.mrb[10].mxu0 }
 0x143   :  { %v210_v38 = vpop.f32.mrb[11].mxu0 }
 0x145   :  { %313 = vadd.xlane.f32.xlu0 %v305_v33 }
 0x1c6   :  { %v308_v39 = vpop.xlane.xlu0 %307  ;;  %v310_v40 = vpop.xlane.xlu1 %309 }
 0x1ca   :  { %v312_v43 = vpop.xlane.xlu1 %311 }
 0x1ce   :  { %v316_v41 = vpop.xlane.xlu0 %315 }
 0x1cf   :  { %v317_v42 = vmax.f32 %v308_v39, %v316_v41 }
 0x1d1   :  { %v318_v45 = vmax.f32 %v317_v42, %v310_v40 }
 0x1d2   :  { %v314_v44 = vpop.xlane.xlu0 %313 }
 0x1d3   :  { %v319_v46 = vmax.f32 %v312_v43, %v314_v44 }
 0x1d5   :  { %v320_v47 = vmax.f32 %v318_v45, %v319_v46 }
 0x1d7   :  { %v321_v48 = vsub.f32 %v308_v39, %v320_v47  ;;  %v322_v49 = vsub.f32 %v310_v40, %v320_v47  ;;  %v323_v50 = vsub.f32 %v312_v43, %v320_v47  ;;  %v324_v51 = vsub.f32 %v314_v44, %v320_v47 }
 0x1d8   :  { %v325_v52 = vsub.f32 %v316_v41, %v320_v47 }
 0x1d9   :  { %v326_v53 = vmul.f32 1.442695, %v321_v48  ;;  %v328_v54 = vmul.f32 1.442695, %v322_v49  ;;  %v330_v55 = vmul.f32 1.442695, %v323_v50 }
 0x1da   :  { %v332_v56 = vmul.f32 1.442695, %v324_v51  ;;  %v334_v57 = vmul.f32 1.442695, %v325_v52 }
 0x1db   :  { %777 = vpow2.f32 %v326_v53 }
 0x1dc   :  { %779 = vpow2.f32 %v328_v54 }
 0x1dd   :  { %781 = vpow2.f32 %v330_v55 }
 0x1de   :  { %783 = vpow2.f32 %v332_v56 }
 0x1df   :  { %785 = vpow2.f32 %v334_v57 }
 0x1e5   :  { %v778_v58 = vpop.eup %777 }
 0x1e6   :  { %v780_v59 = vpop.eup %779  ;;  %v340_v60 = vmul.f32 %v778_v58, %v987_v17 }
 0x1e7   :  { %v782_v61 = vpop.eup %781  ;;  %v336_v62 = vadd.f32 %v780_v59, %v778_v58  ;;  %v341_v63 = vmul.f32 %v780_v59, %v991_v21 }
 0x1e8   :  { %v784_v1 = vpop.eup %783  ;;  %v342_v3 = vmul.f32 %v782_v61, %v997_v26 }
 0x1e9   :  { %v337_v2 = vadd.f32 %v782_v61, %v336_v62  ;;  %v345_v4 = vadd.f32 %v341_v63, %v340_v60  ;;  %v786_v5 = vpop.eup %785  ;;  %v343_v7 = vmul.f32 %v784_v1, %v1007_v32 }
 0x1ea   :  { %v344_v10 = vmul.f32 %v786_v5, %v1013_v35 }
 0x1eb   :  { %v338_v6 = vadd.f32 %v784_v1, %v337_v2  ;;  %v346_v8 = vadd.f32 %v345_v4, %v342_v3 }
 0x1ed   :  { %v339_v9 = vadd.f32 %v786_v5, %v338_v6  ;;  %v347_v11 = vadd.f32 %v346_v8, %v343_v7 }
 0x1ef   :  { %v348_v12 = vadd.f32 %v347_v11, %v344_v10  ;;  %787 = vrcp.f32 %v339_v9 }
 0x1f9   :  { %v788_v13 = vpop.eup %787 }
 0x1fa   :  { %v350_v14 = vmul.f32 %v788_v13, %v348_v12  ;;  %v452_v13 = vld [vmem:[#allocation7] sm:$0xff] }
 0x1fc   :  { %v351_v15 = vadd.f32 %v995_v25, %v350_v14  ;;  %v453_v14 = vld [vmem:[#allocation7 + $0x8] sm:$0xff] }
 0x1fe   :  { %v356_v18 = vmul.f32 %v351_v15, %v1011_v34  ;;  %v352_v19 = vmul.f32 %v351_v15, %v985_v16  ;;  %v354_v22 = vmul.f32 %v351_v15, %v993_v24  ;;  %v353_v23 = vmul.f32 %v351_v15, %v989_v20 }
 0x1ff   :  { %v355_v27 = vmul.f32 %v351_v15, %v1005_v31 }
 0x200   :  { %365 = vadd.xlane.f32.xlu0 %v356_v18  ;;  %357 = vadd.xlane.f32.xlu1 %v352_v19  ;;  %v455_v18 = vld [vmem:[#allocation7 + $0x18] sm:$0xff] }
 0x204   :  { %361 = vadd.xlane.f32.xlu0 %v354_v22  ;;  %359 = vadd.xlane.f32.xlu1 %v353_v23  ;;  %v458_v23 = vld [vmem:[#allocation7 + $0x30] sm:$0xff] }
 0x208   :  { %363 = vadd.xlane.f32.xlu1 %v355_v27 }
 0x28d   :  { %v358_v28 = vpop.xlane.xlu1 %357  ;;  %v366_v29 = vpop.xlane.xlu0 %365 }
 0x28e   :  { %v367_v33 = vmax.f32 %v358_v28, %v366_v29 }
 0x291   :  { %v360_v30 = vpop.xlane.xlu1 %359  ;;  %v362_v25 = vpop.xlane.xlu0 %361 }
 0x292   :  { %v368_v37 = vmax.f32 %v367_v33, %v360_v30 }
 0x295   :  { %v364_v36 = vpop.xlane.xlu1 %363 }
 0x296   :  { %v369_v38 = vmax.f32 %v362_v25, %v364_v36 }
 0x298   :  { %v370_v39 = vmax.f32 %v368_v37, %v369_v38  ;;  %v464_v37 = vld [vmem:[#allocation7 + $0x60] sm:$0xff]  ;;  %v465_v38 = vld [vmem:[#allocation7 + $0x68] sm:$0xff] }
 0x29a   :  { %v371_v40 = vsub.f32 %v358_v28, %v370_v39  ;;  %v372_v41 = vsub.f32 %v360_v30, %v370_v39  ;;  %v373_v42 = vsub.f32 %v362_v25, %v370_v39  ;;  %v374_v43 = vsub.f32 %v364_v36, %v370_v39  ;;  %v460_v28 = vld [vmem:[#allocation7 + $0x40] sm:$0xff]  ;;  %v462_v30 = vld [vmem:[#allocation7 + $0x50] sm:$0xff]  ;;  %v463_v25 = vld [vmem:[#allocation7 + $0x58] sm:$0xff] }
 0x29b   :  { %v375_v44 = vsub.f32 %v366_v29, %v370_v39  ;;  %v461_v29 = vld [vmem:[#allocation7 + $0x48] sm:$0xff]  ;;  %v758_v36 = vpack.c.bf16 %v463_v25, %v462_v30  ;;  %v761_v39 = vpack.c.bf16 %v465_v38, %v464_v37 }
 0x29c   :  { %v376_v45 = vmul.f32 1.442695, %v371_v40  ;;  %v378_v46 = vmul.f32 1.442695, %v372_v41  ;;  %v380_v47 = vmul.f32 1.442695, %v373_v42  ;;  %v755_v33 = vpack.c.bf16 %v461_v29, %v460_v28 }
 0x29d   :  { %v382_v48 = vmul.f32 1.442695, %v374_v43  ;;  %v384_v49 = vmul.f32 1.442695, %v375_v44  ;;  %v466_v40 = vld [vmem:[#allocation7 + $0x70] sm:$0xff]  ;;  %v467_v41 = vld [vmem:[#allocation7 + $0x78] sm:$0xff] }
 0x29e   :  { %789 = vpow2.f32 %v376_v45  ;;  %v764_v42 = vpack.c.bf16 %v467_v41, %v466_v40 }
 0x29f   :  { %791 = vpow2.f32 %v378_v46 }
 0x2a0   :  { %793 = vpow2.f32 %v380_v47 }
 0x2a1   :  { %795 = vpow2.f32 %v382_v48 }
 0x2a2   :  { %797 = vpow2.f32 %v384_v49 }
 0x2a8   :  { %v790_v50 = vpop.eup %789 }
 0x2a9   :  { %v792_v51 = vpop.eup %791  ;;  %v390_v52 = vmul.f32 %v790_v50, %v987_v17 }
 0x2aa   :  { %v794_v53 = vpop.eup %793  ;;  %v386_v54 = vadd.f32 %v792_v51, %v790_v50  ;;  %v391_v55 = vmul.f32 %v792_v51, %v991_v21 }
 0x2ab   :  { %v796_v56 = vpop.eup %795  ;;  %v392_v58 = vmul.f32 %v794_v53, %v997_v26 }
 0x2ac   :  { %v387_v57 = vadd.f32 %v794_v53, %v386_v54  ;;  %v395_v59 = vadd.f32 %v391_v55, %v390_v52  ;;  %v798_v60 = vpop.eup %797  ;;  %v393_v62 = vmul.f32 %v796_v56, %v1007_v32 }
 0x2ad   :  { %v394_v2 = vmul.f32 %v798_v60, %v1013_v35 }
 0x2ae   :  { %v388_v61 = vadd.f32 %v796_v56, %v387_v57  ;;  %v396_v63 = vadd.f32 %v395_v59, %v392_v58 }
 0x2b0   :  { %v389_v1 = vadd.f32 %v798_v60, %v388_v61  ;;  %v397_v3 = vadd.f32 %v396_v63, %v393_v62 }
 0x2b2   :  { %v398_v4 = vadd.f32 %v397_v3, %v394_v2  ;;  %799 = vrcp.f32 %v389_v1 }
 0x2bc   :  { %v800_v5 = vpop.eup %799 }
 0x2bd   :  { %v400_v6 = vmul.f32 %v800_v5, %v398_v4 }
 0x2bf   :  { %v1033_v7 = vadd.f32 %v400_v6, %v351_v15  ;;  %v915_v15 = vmov 0.0|0.0  }
 0x2c0   :  { %742 = vmatprep.subr.bf16.mxu0 %v915_v15 }
 0x2c1   :  { %v406_v8 = vmul.f32 %v1033_v7, %v1011_v34  ;;  %v402_v9 = vmul.f32 %v1033_v7, %v985_v16  ;;  %v404_v10 = vmul.f32 %v1033_v7, %v993_v24  ;;  %v403_v11 = vmul.f32 %v1033_v7, %v989_v20  ;;  %v454_v16 = vld [vmem:[#allocation7 + $0x10] sm:$0xff]  ;;  %v456_v24 = vld [vmem:[#allocation7 + $0x20] sm:$0xff]  ;;  %v457_v20 = vld [vmem:[#allocation7 + $0x28] sm:$0xff] }
 0x2c2   :  { %v405_v12 = vmul.f32 %v1033_v7, %v1005_v31  ;;  %v743_v34 = vpack.c.bf16 %v453_v14, %v452_v13  ;;  %v746_v19 = vpack.c.bf16 %v455_v18, %v454_v16  ;;  %v749_v22 = vpack.c.bf16 %v457_v20, %v456_v24  ;;  %v459_v31 = vld [vmem:[#allocation7 + $0x38] sm:$0xff] }
 0x2c3   :  { %415 = vadd.xlane.f32.xlu1 %v406_v8  ;;  %407 = vadd.xlane.f32.xlu0 %v402_v9  ;;  %v752_v27 = vpack.c.bf16 %v459_v31, %v458_v23 }
 0x2c4   :  { %744 = vmatpush3.bf16.msra.mxu0 %v743_v34 }
 0x2c5   :  { %745 = vmatprep.subr.bf16.mxu0 %v915_v15 }
 0x2c7   :  { %411 = vadd.xlane.f32.xlu1 %v404_v10  ;;  %409 = vadd.xlane.f32.xlu0 %v403_v11 }
 0x2c8   :  { %747 = vmatpush3.bf16.msra.mxu0 %v746_v19 }
 0x2c9   :  { %748 = vmatprep.subr.bf16.mxu0 %v915_v15 }
 0x2cb   :  { %413 = vadd.xlane.f32.xlu0 %v405_v12 }
 0x2cc   :  { %750 = vmatpush3.bf16.msra.mxu0 %v749_v22 }
 0x2cd   :  { %751 = vmatprep.subr.bf16.mxu0 %v915_v15 }
 0x2d0   :  { %753 = vmatpush3.bf16.msra.mxu0 %v752_v27 }
 0x2d1   :  { %754 = vmatprep.subr.bf16.mxu0 %v915_v15 }
 0x2d4   :  { %756 = vmatpush3.bf16.msra.mxu0 %v755_v33 }
 0x2d5   :  { %757 = vmatprep.subr.bf16.mxu0 %v915_v15 }
 0x2d8   :  { %759 = vmatpush3.bf16.msra.mxu0 %v758_v36 }
 0x2d9   :  { %760 = vmatprep.subr.bf16.mxu0 %v915_v15 }
 0x2dc   :  { %762 = vmatpush3.bf16.msra.mxu0 %v761_v39 }
 0x2dd   :  { %763 = vmatprep.subr.bf16.mxu0 %v915_v15 }
 0x2e0   :  { %765 = vmatpush3.bf16.msra.mxu0 %v764_v42 }
 0x350   :  { %v408_v43 = vpop.xlane.xlu0 %407  ;;  %v416_v44 = vpop.xlane.xlu1 %415 }
 0x351   :  { %v417_v46 = vmax.f32 %v408_v43, %v416_v44 }
 0x354   :  { %v410_v45 = vpop.xlane.xlu0 %409  ;;  %v412_v47 = vpop.xlane.xlu1 %411 }
 0x355   :  { %v418_v48 = vmax.f32 %v417_v46, %v410_v45 }
 0x358   :  { %v414_v0 = vpop.xlane.xlu0 %413 }
 0x359   :  { %v419_v49 = vmax.f32 %v412_v47, %v414_v0 }
 0x35b   :  { %v420_v50 = vmax.f32 %v418_v48, %v419_v49 }
 0x35d   :  { %v421_v51 = vsub.f32 %v408_v43, %v420_v50  ;;  %v422_v52 = vsub.f32 %v410_v45, %v420_v50  ;;  %v423_v53 = vsub.f32 %v412_v47, %v420_v50  ;;  %v424_v54 = vsub.f32 %v414_v0, %v420_v50 }
 0x35e   :  { %v425_v55 = vsub.f32 %v416_v44, %v420_v50 }
 0x35f   :  { %v426_v56 = vmul.f32 1.442695, %v421_v51  ;;  %v428_v57 = vmul.f32 1.442695, %v422_v52  ;;  %v430_v58 = vmul.f32 1.442695, %v423_v53 }
 0x360   :  { %v432_v59 = vmul.f32 1.442695, %v424_v54  ;;  %v434_v60 = vmul.f32 1.442695, %v425_v55 }
 0x361   :  { %801 = vpow2.f32 %v426_v56 }
 0x362   :  { %803 = vpow2.f32 %v428_v57 }
 0x363   :  { %805 = vpow2.f32 %v430_v58 }
 0x364   :  { %807 = vpow2.f32 %v432_v59 }
 0x365   :  { %809 = vpow2.f32 %v434_v60 }
 0x36b   :  { %v802_v61 = vpop.eup %801 }
 0x36c   :  { %v804_v62 = vpop.eup %803  ;;  %v440_v63 = vmul.f32 %v802_v61, %v987_v17 }
 0x36d   :  { %v806_v1 = vpop.eup %805  ;;  %v436_v2 = vadd.f32 %v804_v62, %v802_v61  ;;  %v441_v3 = vmul.f32 %v804_v62, %v991_v21 }
 0x36e   :  { %v808_v4 = vpop.eup %807  ;;  %v442_v6 = vmul.f32 %v806_v1, %v997_v26  ;;  %v562_v26 = vld [vmem:[%s1070_s3] ss:$0 sm:$0xff] }
 0x36f   :  { %v437_v5 = vadd.f32 %v806_v1, %v436_v2  ;;  %v445_v8 = vadd.f32 %v441_v3, %v440_v63  ;;  %v810_v9 = vpop.eup %809  ;;  %v443_v11 = vmul.f32 %v808_v4, %v1007_v32 }
 0x370   :  { %v444_v34 = vmul.f32 %v810_v9, %v1013_v35 }
 0x371   :  { %v438_v10 = vadd.f32 %v808_v4, %v437_v5  ;;  %v446_v12 = vadd.f32 %v445_v8, %v442_v6 }
 0x373   :  { %v439_v13 = vadd.f32 %v810_v9, %v438_v10  ;;  %v447_v14 = vadd.f32 %v446_v12, %v443_v11 }
 0x375   :  { %811 = vrcp.f32 %v439_v13  ;;  %v448_v17 = vadd.f32 %v447_v14, %v444_v34 }
 0x37f   :  { %v812_v15 = vpop.eup %811 }
 0x380   :  { %v450_v16 = vmul.f32 %v812_v15, %v448_v17 }
 0x382   :  { %v451_v21 = vadd.f32 %v450_v16, %v1033_v7 }
 0x384   :  { %676 = vmatmul.mubr.f32.vlgmr.msra.gmra.mrb[12].mxu0 %v451_v21 }
 0x457   :  { %v541_v18 = vpop.f32.mrb[12].mxu0 }
 0x458   :  { %v542_v32 = vadd.f32 %v562_v26, %v541_v18  ;;  %v677_v19 = vpop.f32.mrb[13].mxu0 }
 0x45a   :  { %545 = vst [vmem:[#allocation8] sm:$0xff] %v542_v32 }
 0x45b   :  { %890 = shalt.err (!%p887_p0)
}
 0x45c   :  { %s891_s7 = scalar_lea.hbm %s1071_s4, 128 }
 0x45d   :  { %p892_p1 = scmp.ne.s32.totalorder %s1071_s4, %s891_s7  ;;  %p895_p2 = scmp.lt.u32.totalorder %s891_s7, %s1071_s4 }
 0x45f   :  { %p897_p3 = pnand %p895_p2, %p892_p1 }
 0x461   :  { %900 = shalt.err (!%p897_p3)
}
 0x462   :  { %555 = dma.vmem_to_hbm [thread:$0]  %s553_s29, 128, %s1071_s4, [#allocation4]  }
 0x463   :  { %905 = dma.done.wait [#allocation4], 128  }
 0x464   :  { %906 = vsyncadd [#allocation4], 4294967168 }
 0x465   :  { %559 = vsyncpa [#allocation3], 1 }
 0x466   :  { %560 = vsyncpa [#allocation6], 1 }
 0x467   :  { %561 = vsyncpa [#allocation4], 1 }

</bundles_post_ra>
